<compile_context>
chip_gen: v5e
topology: v5e:2x2
jax: 0.10.0
libtpu: 0.0.40
codegen_flags: <defaults>
</compile_context>

<pallas_src>
import jax
import jax.numpy as jnp
from jax.experimental import pallas as pl
from jax.experimental.pallas import tpu as pltpu


def _round_up(a, b):
    return (a + b - 1) // b * b


_TILE_BYTES = 4 << 20  # ~4 MiB per (f32-equivalent) input tile


def _tile_sizes(M, L):
    """Pick (TR, TL): TR multiple of 8 (<=512), TL multiple of 128, ~4 MiB/tile."""
    TR = min(512, _round_up(M, 8))
    L128 = _round_up(L, 128)
    lanes_budget = max(128, ((_TILE_BYTES // 4) // TR) // 128 * 128)
    TL = min(L128, lanes_budget)
    # v7x megacore: make sure there are >= 2 blocks along a 'parallel' axis when the
    # problem would otherwise be a single block, so both TensorCores get work.
    if pl.cdiv(M, TR) * pl.cdiv(L, TL) == 1:
        if TL >= 256:
            TL = max(128, (TL // 2) // 128 * 128)
        elif TR >= 16:
            TR = max(8, (TR // 2) // 8 * 8)
    return TR, TL


def _make_kernel(qmin, qmax, f_scale, inv_f_scale, quant_output):
    """Elementwise bias-add + output fake-quant on a lane-dense (TR, TL) tile."""

    def kernel(x_ref, b_ref, o_ref):
        # Upcast at the load (input may arrive as bf16); compute stays f32 so the
        # same kernel is correct on v5e (no bf16 VPU there).
        y = x_ref[...].astype(jnp.float32) + b_ref[...]   # (TR,TL) + (TR,1) broadcast
        if quant_output:
            # floor + symmetric clamp; inverse scale is an exact power of two.
            y = jnp.clip(jnp.floor(y * f_scale), qmin, qmax) * inv_f_scale
        o_ref[...] = y.astype(o_ref.dtype)

    return kernel


def quantized_bias(x_nchw, bias, bias_frac, feature_frac, *, bitwidth=8,
                   quant_output=True, quant_bias=True, for_training=True,
                   bias_term=True, out_dtype=None):
    """QuantizedBias.forward.  x: (N, C, H, W), bias: (C,), bias_frac: scalar or (C,)."""
    N, C, H, W = x_nchw.shape
    out_dtype = x_nchw.dtype if out_dtype is None else jnp.dtype(out_dtype)

    qmin = float(-(2 ** (bitwidth - 1)))
    qmax = float(2 ** (bitwidth - 1) - 1)
    ff = int(feature_frac)
    f_scale = float(2.0 ** ff)
    inv_f_scale = float(2.0 ** (-ff))

    # ---- parameter setup + bias fake-quant (grid-invariant -> hoisted to glue) ----
    b = jnp.asarray(bias, jnp.float32).reshape(-1)
    b = jnp.broadcast_to(b, (C,))
    if quant_output and for_training and bias_term:
        # module adds half an output-LSB at setup so that floor == round-to-nearest
        b = b + 2.0 ** (-1 - ff)
    if quant_bias:
        bf = jnp.asarray(bias_frac, jnp.float32)
        b_scale = jnp.broadcast_to(jnp.atleast_1d(2.0 ** bf), (C,))
        b_inv_scale = jnp.broadcast_to(jnp.atleast_1d(2.0 ** (-bf)), (C,))  # exact inverse
        b = jnp.clip(jnp.round(b * b_scale), qmin, qmax) * b_inv_scale

    # ---- lane-dense 2-D layout: rows = N*C (per-row bias), lanes = H*W ----
    # reshape only: no astype, no pad -> no extra HBM round trips in the wrapper.
    M = N * C
    L = H * W
    x2 = x_nchw.reshape(M, L)
    b_rows = jnp.tile(b, N).reshape(M, 1)     # row r = n*C + c  ->  b[c]   (tiny)

    TR, TL = _tile_sizes(M, L)
    # grid: lane axis innermost so the bias block index (i, 0) is unchanged across
    # the inner loop and its (TR,1) tile is not re-DMA'd per lane tile.
    grid = (pl.cdiv(M, TR), pl.cdiv(L, TL))

    elem = M * L
    in_bytes = jnp.dtype(x2.dtype).itemsize
    out_bytes = out_dtype.itemsize
    cost = pl.CostEstimate(
        flops=(6 if quant_output else 1) * elem,
        transcendentals=0,
        bytes_accessed=elem * (in_bytes + out_bytes) + M * 4,
    )

    kernel = _make_kernel(qmin, qmax, f_scale, inv_f_scale, quant_output)

    out2 = pl.pallas_call(
        kernel,
        out_shape=jax.ShapeDtypeStruct((M, L), out_dtype),
        grid_spec=pltpu.PrefetchScalarGridSpec(
            num_scalar_prefetch=0,
            grid=grid,
            in_specs=[
                pl.BlockSpec((TR, TL), lambda i, j: (i, j)),
                pl.BlockSpec((TR, 1), lambda i, j: (i, 0)),
            ],
            out_specs=pl.BlockSpec((TR, TL), lambda i, j: (i, j)),
        ),
        compiler_params=pltpu.CompilerParams(
            dimension_semantics=("parallel", "parallel"),
            vmem_limit_bytes=32 * 1024 * 1024),   # safe on v7x (64 MiB physical)
        cost_estimate=cost,
    )(x2, b_rows)

    return out2.reshape(N, C, H, W)


def _reference(x_nchw, bias, bias_frac, feature_frac, *, bitwidth=8,
               quant_output=True, quant_bias=True, for_training=True,
               bias_term=True):
    """Pure-JAX reference reproducing the PyTorch forward."""
    N, C, H, W = x_nchw.shape
    qmin = -(2 ** (bitwidth - 1))
    qmax = 2 ** (bitwidth - 1) - 1

    b = jnp.broadcast_to(jnp.asarray(bias, jnp.float32).reshape(-1), (C,))
    b = b.reshape(1, C, 1, 1)
    if quant_output and for_training and bias_term:
        b = b + 2.0 ** (-1 - int(feature_frac))
    if quant_bias:
        bs = jnp.broadcast_to(
            jnp.atleast_1d(2.0 ** jnp.asarray(bias_frac, jnp.float32)),
            (C,)).reshape(1, C, 1, 1)
        b = jnp.clip(jnp.round(b * bs), qmin, qmax) / bs

    y = x_nchw.astype(jnp.float32) + b
    if quant_output:
        fs = 2.0 ** int(feature_frac)
        y = jnp.clip(jnp.floor(y * fs), qmin, qmax) / fs
    return y


if __name__ == "__main__":
    key = jax.random.PRNGKey(0)
    kx, kb = jax.random.split(key)

    N, C, H, W = 2, 4, 16, 16
    x = jax.random.normal(kx, (N, C, H, W), jnp.float32)
    bias = jax.random.normal(kb, (C,), jnp.float32) * 0.1
    bias_frac = jnp.array([5.0, 6.0, 5.0, 6.0], jnp.float32)
    feature_frac = 4

    ref = _reference(x, bias, bias_frac, feature_frac)

    # default: output dtype == input dtype (matches the PyTorch module)
    out = quantized_bias(x, bias, bias_frac, feature_frac)
    out = jax.block_until_ready(out)
    assert out.shape == (N, C, H, W) and out.dtype == x.dtype
    assert jnp.allclose(out, ref, atol=1e-6), float(jnp.max(jnp.abs(out - ref)))

    # optional bandwidth optimisation: bf16 store is lossless for bitwidth=8 outputs
    # (values are k * 2^-feature_frac with |k| <= 128).
    out_bf16 = quantized_bias(x, bias, bias_frac, feature_frac,
                              out_dtype=jnp.bfloat16)
    out_bf16 = jax.block_until_ready(out_bf16)
    assert jnp.allclose(out_bf16.astype(jnp.float32), ref, atol=1e-6)

    print("KERNEL_OK")
</pallas_src>

<mosaic_0001>
module attributes {stable_mosaic.version = 11 : i64} {
  func.func @kernel(%arg0: i32, %arg1: i32, %arg2: memref<8x128xf32, #tpu.memory_space<vmem>>, %arg3: memref<8x1xf32, #tpu.memory_space<vmem>>, %arg4: memref<8x128xf32, #tpu.memory_space<vmem>>) attributes {dimension_semantics = [#tpu.dimension_semantics<parallel>, #tpu.dimension_semantics<parallel>], iteration_bounds = array<i64: 1, 2>, scalar_prefetch = 0 : i64, scratch_operands = 0 : i64, tpu.core_type = #tpu.core_type<tc>, window_params = [{transform_indices = @transform_0, window_bounds = array<i64: 8, 128>}, {transform_indices = @transform_1, window_bounds = array<i64: 8, 1>}, {transform_indices = @transform_2, window_bounds = array<i64: 8, 128>}]} {
    %c0 = arith.constant 0 : index
    %c0_0 = arith.constant 0 : index
    %0 = vector.load %arg2[%c0, %c0_0] : memref<8x128xf32, #tpu.memory_space<vmem>>, vector<8x128xf32>
    %c0_1 = arith.constant 0 : index
    %c0_2 = arith.constant 0 : index
    %1 = vector.load %arg3[%c0_1, %c0_2] : memref<8x1xf32, #tpu.memory_space<vmem>>, vector<8x1xf32>
    %2 = vector.broadcast %1 : vector<8x1xf32> to vector<8x128xf32>
    %3 = arith.addf %0, %2 : vector<8x128xf32>
    %cst = arith.constant 1.600000e+01 : f32
    %4 = vector.broadcast %cst : f32 to vector<8x128xf32>
    %5 = arith.mulf %3, %4 : vector<8x128xf32>
    %6 = math.floor %5 : vector<8x128xf32>
    %cst_3 = arith.constant -1.280000e+02 : f32
    %cst_4 = arith.constant 1.270000e+02 : f32
    %7 = vector.broadcast %cst_3 : f32 to vector<8x128xf32>
    %8 = arith.maximumf %7, %6 : vector<8x128xf32>
    %9 = vector.broadcast %cst_4 : f32 to vector<8x128xf32>
    %10 = arith.minimumf %9, %8 : vector<8x128xf32>
    %cst_5 = arith.constant 6.250000e-02 : f32
    %11 = vector.broadcast %cst_5 : f32 to vector<8x128xf32>
    %12 = arith.mulf %10, %11 : vector<8x128xf32>
    %c0_6 = arith.constant 0 : index
    %c0_7 = arith.constant 0 : index
    %13 = vector.load %arg4[%c0_6, %c0_7] : memref<8x128xf32, #tpu.memory_space<vmem>>, vector<8x128xf32>
    tpu.vector_store %arg4[%c0_6, %c0_7], %12 {strides = array<i32>} : memref<8x128xf32, #tpu.memory_space<vmem>>, vector<8x128xf32>,
    return
  }
  func.func @transform_0(%arg0: i32, %arg1: i32) -> (i32, i32) {
    %c0_i32 = arith.constant 0 : i32
    return %arg0, %arg1 : i32, i32
  }
  func.func @transform_1(%arg0: i32, %arg1: i32) -> (i32, i32) {
    %c0_i32 = arith.constant 0 : i32
    %c0_i32_0 = arith.constant 0 : i32
    return %arg0, %c0_i32 : i32, i32
  }
  func.func @transform_2(%arg0: i32, %arg1: i32) -> (i32, i32) {
    %c0_i32 = arith.constant 0 : i32
    return %arg0, %arg1 : i32, i32
  }
}

</mosaic_0001>

<bundles_post_ra>
// kernel: tpu_custom_call.1
= control target key start
LH: loop header
LB: loop body
LE: loop exit
PB: predicated region body
PF: predicated region fallthrough
CT: control target
= control target key end

     0   :  { %7 = vsyncpa [#allocation3], 0  ;;  %s656_s0 = inlined_call_operand.hbm [shape: f32[8,256], index: 0, kind: input, shape index: {}]   ;;  %s657_s1 = inlined_call_operand.vmem [shape: f32[8,1], index: 1, kind: input, shape index: {}]   ;;  %s658_s2 = inlined_call_operand.hbm [shape: f32[8,256], index: 2, kind: output, shape index: {}]  }
   0x1   :  { %9 = vsyncpa [#allocation3 + $0x1], 0 }
   0x2   :  { %10 = vsyncpa [#allocation4], 0 }
   0x3   :  { %12 = vsyncpa [#allocation4 + $0x1], 0  ;;  %s533_s9 = smov 0   ;;  %s535_s10 = smov 0  }
   0x4   :  { %s537_s11 = smov 0   ;;  %s539_s12 = smov 0  }
   0x5   :  { %s541_s13 = smov 0   ;;  %s543_s14 = smov 0  }
   0x6 LB: > { %s325_s15 = sadd.s32 4294967295, %s515_s14   ;;  %s326_s16 = sadd.s32 4294967294, %s515_s14   ;;  %s515_s14 = sphi %s543_s14, %s18_s14   ;;  %s511_s13 = sphi %s541_s13, %s667_s13   ;;  %s507_s12 = sphi %s539_s12, %s666_s12   ;;  %s503_s11 = sphi %s537_s11, %s665_s11   ;;  %s499_s10 = sphi %s535_s10, %s664_s10   ;;  %s495_s9 = sphi %s533_s9, %s663_s9  }
   0x7   : > { %s27_s17 = sadd.s32 1, %s511_s13  ;;  %s39_s18 = sadd.s32 1, %s503_s11 }
   0x8   : > { %p28_p0 = scmp.ge.s32.totalorder %s27_s17, 2  ;;  %p46_p1 = scmp.ne.s32.totalorder %s503_s11, %s499_s10 }
   0x9   : > { %p47_p2 = scmp.eq.s32.totalorder %s515_s14, 0  ;;  %p52_p3 = scmp.ne.s32.totalorder %s499_s10, %s495_s9 }
   0xa   : > { %s669_s17 = smov (%p28_p0, %s27_s17), 0  ;;  %p53_p5 = scmp.eq.s32.totalorder %s325_s15, 0 }
   0xb   : > { %p574_p4 = por %p47_p2, %p46_p1  ;;  %s35_s20 = ssub.s32 %s511_s13, %s669_s17 }
   0xc   : > { %p104_p6 = scmp.eq.s32.totalorder %s325_s15, 1  ;;  %p37_p7 = scmp.eq.s32.totalorder %s35_s20, 0 }
   0xd   : > { %p580_p8 = por %p53_p5, %p52_p3  ;;  %p110_p10 = scmp.eq.s32.totalorder %s326_s16, 1 }
   0xe   : > { %p584_p9 = por %p104_p6, %p46_p1  ;;  %p329_p12 = scmp.ge.s32.totalorder %s515_s14, 2 }
   0xf   : > { %s589_s23 = scalar_select %p37_p7, %s503_s11, %s39_s18  }
  0x10   : > { %p591_p11 = por %p110_p10, %p52_p3  ;;  %p351_p13 = scmp.lt.s32.totalorder %s515_s14, 2 }
  0x11   : > { %s137_s25 = sand.u32 1, %s503_s11   ;;  %s331_s27 = sshll.u32 %s511_s13, 3 }
  0x12   : > { %s330_s26 = sshll.u32 %s137_s25, 3  ;;  %s147_s30 = scalar_lea.hbm %s656_s0, %s331_s27 }
  0x13   : > { %s141_s3 = scalar_lea.vmem [#allocation2], %s330_s26  ;;  %s149_s5 = sshll.u32 %s147_s30, 4  ;;  %s150_s5 = int_to_ptr.hbm [resolvable:$true] %s149_s5 }
  0x14   : > { %s151_s4 = sshll.u32 %s141_s3, 4  ;;  %p344_p0 = pnand %p351_p13, %p574_p4  ;;  %s152_s4 = int_to_ptr.vmem [resolvable:$true] %s151_s4 }
  0x15   : > { %p332_p1 = scmp.ge.s32.totalorder %s515_s14, 1  ;;  %p156_p2 = scmp.lt.s32.totalorder %s515_s14, 3 }
  0x16   : > { %s138_s6 = scalar_lea.sflag [#allocation3], %s137_s25 }
  0x17   : > { %346 = dma.hbm_to_vmem [thread:$0]  (!%p344_p0), %s150_s5, 128, %s152_s4, %s138_s6  }
  0x18   : > { %p157_p3 = pnand %p332_p1, %p156_p2 }
  0x19   : > { %s607_s7 = sand.u32 (!%p157_p3), 1, %s499_s10  }
  0x1a   : > { %160 = sbr.rel (%p157_p3) target bundleno = 164 (0xa4), region = 28  ;;  %s333_s8 = sshll.u32 (!%p157_p3), %s607_s7, 3 }
  0x1b   : > { %s163_s15 = scalar_lea.sflag (!%p157_p3), [#allocation3], %s607_s7  ;;  %s166_s16 = scalar_lea.vmem (!%p157_p3), [#allocation2], %s333_s8 }
  0x1f   : > { %486 = dma.done.wait (%p580_p8), %s163_s15, 128  }
  0x20   : > { %488 = vsyncadd (%p580_p8), %s163_s15, 4294967168  ;;  %v517_v0 = vmov 0   ;;  %v197_v1 = vld [vmem:[%s657_s1] sm:$0xff]  ;;  %s336_s20 = sshll.u32 %s507_s12, 3  ;;  %s191_s27 = scalar_lea.vmem [#allocation5], %s333_s8 }
  0x21   : > { %402 = vset.pattern.permute.xlu0 %v517_v0  ;;  %v196_v2 = vld [vmem:[%s166_s16] sm:$0xff]  ;;  %s223_s21 = scalar_lea.hbm %s658_s2, %s336_s20  ;;  %s225_s28 = sshll.u32 %s191_s27, 4  ;;  %s226_s28 = int_to_ptr.vmem [resolvable:$true] %s225_s28 }
  0x22   : > { %200 = vperm.xlu0 %402, %v197_v1   ;;  %s227_s29 = sshll.u32 %s223_s21, 4  ;;  %s211_s30 = scalar_lea.sflag [#allocation4], %s607_s7  ;;  %s228_s29 = int_to_ptr.hbm [resolvable:$true] %s227_s29 }
  0x23   : > { %s447_s3 = sshra.s32 %s228_s29, 4  ;;  %s453_s6 = scalar_lea.hbm %s658_s2, 16  ;;  %s448_s3 = int_to_ptr.hbm [resolvable:$true] %s447_s3 }
  0x24   : > { %s449_s12 = scalar_lea.hbm %s448_s3, 8  ;;  %p454_p7 = scmp.lt.s32.totalorder %s448_s3, %s658_s2 }
  0x25   : > { %p450_p4 = scmp.ne.s32.totalorder %s448_s3, %s449_s12  ;;  %p455_p8 = scmp.lt.s32.totalorder %s453_s6, %s449_s12 }
  0x27   : > { %p451_p5 = pnand %p450_p4, %p584_p9  ;;  %p456_p10 = por %p455_p8, %p454_p7 }
  0x29   : > { %p452_p6 = pneg %p451_p5 }
  0x2b   : > { %p457_p13 = pnand %p456_p10, %p452_p6 }
  0x94   : > { %v201_v3 = vpop.permute.xlu0 %200 }
  0x95   : > { %v203_v4 = vadd.f32 %v201_v3, %v196_v2 }
  0x97   : > { %v204_v5 = vmul.f32 16.0, %v203_v4 }
  0x99   : > { %v205_v6 = vfloor.f32 %v204_v5 }
  0x9b   : > { %v206_v7 = vmax.f32 %v205_v6, -128.0 }
  0x9d   : > { %v207_v8 = vmin.f32 %v206_v7, 127.0 }
  0x9f   : > { %v208_v9 = vmul.f32 0.0625, %v207_v8 }
  0xa1   : > { %209 = vst [vmem:[%s191_s27] sm:$0xff] %v208_v9 }
  0xa2   : > { %460 = shalt.err (!%p457_p13)
}
  0xa3   : > { %341 = dma.vmem_to_hbm [thread:$0]  (%p584_p9), %s226_s28, 128, %s228_s29, %s211_s30  }
  0xa4 PF: > { %s239_s7 = sand.u32 1, %s495_s9   ;;  %p348_p0 = pnand %p329_p12, %p591_p11 }
  0xa5   : > { %s240_s16 = scalar_lea.sflag [#allocation4], %s239_s7 }
  0xa6   : > { %p349_p1 = pneg %p348_p0 }
  0xa8   : > { %490 = dma.done.wait (%p349_p1), %s240_s16, 128  }
  0xa9   : > { %492 = vsyncadd (%p349_p1), %s240_s16, 4294967168  ;;  %s18_s14 = sadd.s32 1, %s515_s14   ;;  %s663_s9 = smov %s499_s10 }
  0xaa   : > { %p15_p2 = scmp.ge.s32.totalorder %s18_s14, 4   ;;  %s664_s10 = smov %s503_s11 }
  0xab   : > { %s665_s11 = smov %s589_s23  ;;  %s666_s12 = smov %s511_s13 }
  0xac   : > { %s667_s13 = smov %s669_s17  ;;  %17 = sbr.rel (!%p15_p2) target bundleno = 6 (0x6), region = 76 }
  0xb1   :  { %246 = vsyncpa [#allocation3], 1 }
  0xb2   :  { %248 = vsyncpa [#allocation3 + $0x1], 1 }
  0xb3   :  { %249 = vsyncpa [#allocation4], 1 }
  0xb4   :  { %251 = vsyncpa [#allocation4 + $0x1], 1 }

</bundles_post_ra>
